<compile_context>
chip_gen: v5e
topology: v5e:2x2
jax: 0.10.0
libtpu: 0.0.40
codegen_flags: <defaults>
</compile_context>

<pallas_src>
import functools

import jax
import jax.numpy as jnp
from jax import lax
from jax.experimental import pallas as pl
from jax.experimental.pallas import tpu as pltpu

BN_EPS = 1e-5
LANE = 128


def probvar_kernel(x_ref,      # VMEM (PT, B, dim_pad)     PT problems' batches (lane-padded)
                   w1t_ref,    # VMEM (dim_pad, dim_pad)   W1^T, zero-padded rows/cols
                   vecs_ref,   # VMEM (3, dim_pad)         rows: [gamma, beta, b2'=w_act*b2+b_act]
                   w2t_ref,    # VMEM (dim_pad, dim_pad)   (w_act*W2)^T, zero-padded
                   o_ref):     # VMEM (PT, B, dim_pad)     lane-dense output
    PT, B, dim_pad = x_ref.shape
    vecs = vecs_ref[...]                          # (3, dim_pad)
    gamma = vecs[0:1, :]
    beta = vecs[1:2, :]
    b2 = vecs[2:3, :]

    # ---- Linear 1 on the flattened batch (b1 cancels under training-mode BN) ----
    x = x_ref[...].reshape(PT * B, dim_pad)
    h = jnp.dot(x, w1t_ref[...], preferred_element_type=jnp.float32)   # (PT*B, dim_pad)
    h3 = h.reshape(PT, B, dim_pad)

    # ---- BatchNorm1d (training mode, biased batch stats) per problem, folded to scale/shift ----
    mean = jnp.mean(h3, axis=1, keepdims=True)                 # (PT, 1, dim_pad)
    hm = h3 - mean
    var = jnp.mean(hm * hm, axis=1, keepdims=True)             # (PT, 1, dim_pad)
    scale = gamma[None] * lax.rsqrt(var + BN_EPS)              # (PT, 1, dim_pad)
    shift = beta[None] - mean * scale
    # (padded lanes: gamma=0 -> scale=0; zero-padded problems: var=0 -> rsqrt(eps), finite)

    # ---- BN apply + ReLU ----
    h3 = jnp.maximum(h3 * scale + shift, 0.0)

    # ---- Linear 2 with act-Linear folded in: h @ (w_act*W2)^T + (w_act*b2 + b_act) ----
    h2 = h3.reshape(PT * B, dim_pad)
    o = jnp.dot(h2, w2t_ref[...], preferred_element_type=jnp.float32) + b2
    o_ref[...] = o.reshape(PT, B, dim_pad)


def init_params(key, dim):
    """Raw parameters mimicking nn.Linear / nn.BatchNorm1d defaults (PyTorch layout)."""
    k1, k2, k3, k4, k5, k6 = jax.random.split(key, 6)
    bound = 1.0 / jnp.sqrt(dim)
    return {
        "w1": jax.random.uniform(k1, (dim, dim), jnp.float32, -bound, bound),
        "b1": jax.random.uniform(k2, (dim,), jnp.float32, -bound, bound),
        "gamma": jnp.ones((dim,), jnp.float32),
        "beta": jnp.zeros((dim,), jnp.float32),
        "w2": jax.random.uniform(k3, (dim, dim), jnp.float32, -bound, bound),
        "b2": jax.random.uniform(k4, (dim,), jnp.float32, -bound, bound),
        # act = nn.Linear(1, 1): scalar weight & bias, bound = 1/sqrt(1) = 1
        "w_act": jax.random.uniform(k5, (), jnp.float32, -1.0, 1.0),
        "b_act": jax.random.uniform(k6, (), jnp.float32, -1.0, 1.0),
    }


def prepare_params(params, dim):
    """One-time param transform (outside the hot path): transpose, lane-pad to a
    multiple of 128 on BOTH matmul axes, fold act-Linear into W2/b2, drop b1
    (it cancels exactly under training-mode BatchNorm mean subtraction)."""
    dim_pad = max(LANE, ((dim + LANE - 1) // LANE) * LANE)

    w1t = jnp.zeros((dim_pad, dim_pad), jnp.float32).at[:dim, :dim].set(params["w1"].T)

    w2_folded = params["w_act"] * params["w2"]                       # (dim, dim)
    b2_folded = params["w_act"] * params["b2"] + params["b_act"]     # (dim,)
    w2t = jnp.zeros((dim_pad, dim_pad), jnp.float32).at[:dim, :dim].set(w2_folded.T)

    vecs = jnp.zeros((3, dim_pad), jnp.float32)
    vecs = vecs.at[0, :dim].set(params["gamma"])
    vecs = vecs.at[1, :dim].set(params["beta"])
    vecs = vecs.at[2, :dim].set(b2_folded)

    return {"dim": dim, "dim_pad": dim_pad, "w1t": w1t, "vecs": vecs, "w2t": w2t}


def _choose_pt(P, B, min_grid_steps):
    """Problems per grid step: target M = PT*B ~= 256 (MXU depth on v6e/v7x), but keep
    at least `min_grid_steps` grid steps when P allows so v7x's second TensorCore is
    fed via the parallel problem axis (near-free on single-TC v5e/v6e)."""
    pt = min(P, max(1, 256 // max(B, 1)))
    if P >= min_grid_steps > 1:
        pt = min(pt, -(-P // min_grid_steps))
    return max(1, pt)


@functools.partial(jax.jit, static_argnames=("min_grid_steps",))
def probvar_forward(x, prep, min_grid_steps=2):
    """x: (B, dim) for one module invocation, or (P, B, dim) for P stacked independent
    invocations (each problem gets its own batch-norm statistics)."""
    squeeze = x.ndim == 2
    if squeeze:
        x = x[None]
    P, B, dim = x.shape
    dim_pad = prep["w1t"].shape[1]

    pt = _choose_pt(P, B, min_grid_steps)
    grid_p = -(-P // pt)
    P_pad = grid_p * pt

    # One cheap pad covering all problems: lane-pad features and round P up to a
    # multiple of PT (zero problems are numerically benign and discarded below).
    xp = jnp.pad(x, ((0, P_pad - P), (0, 0), (0, dim_pad - dim)))

    cost = pl.CostEstimate(
        flops=int(P_pad * B * 2 * dim_pad * dim_pad * 2),
        transcendentals=int(P_pad * dim_pad),
        bytes_accessed=int(4 * (xp.size + P_pad * B * dim_pad
                                + prep["w1t"].size + prep["w2t"].size + prep["vecs"].size)),
    )

    out = pl.pallas_call(
        probvar_kernel,
        out_shape=jax.ShapeDtypeStruct((P_pad, B, dim_pad), jnp.float32),
        grid=(grid_p,),
        in_specs=[
            pl.BlockSpec((pt, B, dim_pad), lambda p: (p, 0, 0)),     # PT problems per step
            pl.BlockSpec((dim_pad, dim_pad), lambda p: (0, 0)),      # W1^T (resident)
            pl.BlockSpec((3, dim_pad), lambda p: (0, 0)),            # packed per-feature vectors
            pl.BlockSpec((dim_pad, dim_pad), lambda p: (0, 0)),      # folded W2^T (resident)
        ],
        out_specs=pl.BlockSpec((pt, B, dim_pad), lambda p: (p, 0, 0)),
        compiler_params=pltpu.CompilerParams(
            dimension_semantics=("parallel",),
        ),
        cost_estimate=cost,
    )(xp, prep["w1t"], prep["vecs"], prep["w2t"])

    out = out[:P, :, :dim]        # drop problem + lane padding (keeps kernel stores unmasked)
    return out[0] if squeeze else out


def probvar_reference(x, params):
    """Pure-JAX reference of the PyTorch forward (training-mode BN) for one (B, dim) batch."""
    h = x @ params["w1"].T + params["b1"]
    mean = h.mean(axis=0, keepdims=True)
    var = ((h - mean) ** 2).mean(axis=0, keepdims=True)
    h = params["gamma"] * (h - mean) / jnp.sqrt(var + BN_EPS) + params["beta"]
    h = jnp.maximum(h, 0.0)
    h = h @ params["w2"].T + params["b2"]
    return h * params["w_act"] + params["b_act"]


# TODO(synk): BatchNorm1d running_mean / running_var buffer updates (training-step side
# effect) are not reproduced; only the normalized forward output is computed.

if __name__ == "__main__":
    key = jax.random.PRNGKey(0)
    kx, kxs, kp = jax.random.split(key, 3)

    B, dim = 8, 32
    P = 3  # number of stacked ProbVar invocations sharing parameters

    params = init_params(kp, dim)
    prep = prepare_params(params, dim)   # one-time transform, outside the hot path

    # --- single invocation (B, dim) ---
    x = jax.random.normal(kx, (B, dim), jnp.float32)
    out = jax.block_until_ready(probvar_forward(x, prep))
    ref = probvar_reference(x, params)
    assert out.shape == (B, dim)
    assert jnp.allclose(out, ref, atol=1e-4, rtol=1e-4), "single-problem mismatch vs reference"

    # --- stacked invocations (P, B, dim): one pallas_call, problems batched per grid step ---
    xs = jax.random.normal(kxs, (P, B, dim), jnp.float32)
    outs = jax.block_until_ready(probvar_forward(xs, prep))
    refs = jnp.stack([probvar_reference(xs[p], params) for p in range(P)])
    assert outs.shape == (P, B, dim)
    assert jnp.allclose(outs, refs, atol=1e-4, rtol=1e-4), "stacked-problem mismatch vs reference"

    print("KERNEL_OK")
</pallas_src>

<mosaic_0001>
module attributes {stable_mosaic.version = 11 : i64} {
  func.func @probvar_kernel(%arg0: i32, %arg1: memref<1x8x128xf32, #tpu.memory_space<vmem>>, %arg2: memref<128x128xf32, #tpu.memory_space<vmem>>, %arg3: memref<3x128xf32, #tpu.memory_space<vmem>>, %arg4: memref<128x128xf32, #tpu.memory_space<vmem>>, %arg5: memref<1x8x128xf32, #tpu.memory_space<vmem>>) attributes {dimension_semantics = [#tpu.dimension_semantics<parallel>], iteration_bounds = array<i64: 1>, scalar_prefetch = 0 : i64, scratch_operands = 0 : i64, tpu.core_type = #tpu.core_type<tc>, window_params = [{transform_indices = @transform_0, window_bounds = array<i64: 1, 8, 128>}, {pipeline_mode = #tpu.pipeline_mode<synchronous>, transform_indices = @transform_1, window_bounds = array<i64: 128, 128>}, {pipeline_mode = #tpu.pipeline_mode<synchronous>, transform_indices = @transform_2, window_bounds = array<i64: 3, 128>}, {pipeline_mode = #tpu.pipeline_mode<synchronous>, transform_indices = @transform_3, window_bounds = array<i64: 128, 128>}, {transform_indices = @transform_4, window_bounds = array<i64: 1, 8, 128>}]} {
    %c0 = arith.constant 0 : index
    %c0_0 = arith.constant 0 : index
    %0 = vector.load %arg3[%c0, %c0_0] : memref<3x128xf32, #tpu.memory_space<vmem>>, vector<3x128xf32>
    %1 = vector.extract_strided_slice %0 {offsets = [0, 0], sizes = [1, 128], strides = [1, 1]} : vector<3x128xf32> to vector<1x128xf32>
    %2 = vector.extract_strided_slice %0 {offsets = [1, 0], sizes = [1, 128], strides = [1, 1]} : vector<3x128xf32> to vector<1x128xf32>
    %3 = vector.extract_strided_slice %0 {offsets = [2, 0], sizes = [1, 128], strides = [1, 1]} : vector<3x128xf32> to vector<1x128xf32>
    %c0_1 = arith.constant 0 : index
    %c0_2 = arith.constant 0 : index
    %c0_3 = arith.constant 0 : index
    %4 = vector.load %arg1[%c0_1, %c0_2, %c0_3] : memref<1x8x128xf32, #tpu.memory_space<vmem>>, vector<1x8x128xf32>
    %5 = vector.shape_cast %4 : vector<1x8x128xf32> to vector<8x128xf32>
    %c0_4 = arith.constant 0 : index
    %c0_5 = arith.constant 0 : index
    %6 = vector.load %arg2[%c0_4, %c0_5] : memref<128x128xf32, #tpu.memory_space<vmem>>, vector<128x128xf32>
    %cst = arith.constant dense<0.000000e+00> : vector<8x128xf32>
    %7 = tpu.matmul %5, %6, %cst {dimension_numbers = #tpu.dot_dimension_numbers<[1], [0], [0], [1], [0, 0, 1, 1], [], []>} : vector<8x128xf32>, vector<128x128xf32>, vector<8x128xf32> -> vector<8x128xf32>
    %8 = vector.shape_cast %7 : vector<8x128xf32> to vector<1x8x128xf32>
    %cst_6 = arith.constant dense<0.000000e+00> : vector<1x128xf32>
    %9 = vector.multi_reduction <add>, %8, %cst_6 [1] : vector<1x8x128xf32> to vector<1x128xf32>
    %10 = vector.shape_cast %9 : vector<1x128xf32> to vector<1x1x128xf32>
    %cst_7 = arith.constant 8.000000e+00 : f32
    %11 = vector.broadcast %cst_7 : f32 to vector<1x1x128xf32>
    %12 = arith.divf %10, %11 : vector<1x1x128xf32>
    %13 = vector.broadcast %12 : vector<1x1x128xf32> to vector<1x8x128xf32>
    %14 = arith.subf %8, %13 : vector<1x8x128xf32>
    %15 = arith.mulf %14, %14 : vector<1x8x128xf32>
    %cst_8 = arith.constant dense<0.000000e+00> : vector<1x128xf32>
    %16 = vector.multi_reduction <add>, %15, %cst_8 [1] : vector<1x8x128xf32> to vector<1x128xf32>
    %17 = vector.shape_cast %16 : vector<1x128xf32> to vector<1x1x128xf32>
    %cst_9 = arith.constant 8.000000e+00 : f32
    %18 = vector.broadcast %cst_9 : f32 to vector<1x1x128xf32>
    %19 = arith.divf %17, %18 : vector<1x1x128xf32>
    %20 = vector.shape_cast %1 : vector<1x128xf32> to vector<1x1x128xf32>
    %cst_10 = arith.constant 9.99999974E-6 : f32
    %21 = vector.broadcast %cst_10 : f32 to vector<1x1x128xf32>
    %22 = arith.addf %19, %21 : vector<1x1x128xf32>
    %23 = math.rsqrt %22 : vector<1x1x128xf32>
    %24 = arith.mulf %20, %23 : vector<1x1x128xf32>
    %25 = vector.shape_cast %2 : vector<1x128xf32> to vector<1x1x128xf32>
    %26 = arith.mulf %12, %24 : vector<1x1x128xf32>
    %27 = arith.subf %25, %26 : vector<1x1x128xf32>
    %28 = vector.broadcast %24 : vector<1x1x128xf32> to vector<1x8x128xf32>
    %29 = arith.mulf %8, %28 : vector<1x8x128xf32>
    %30 = vector.broadcast %27 : vector<1x1x128xf32> to vector<1x8x128xf32>
    %31 = arith.addf %29, %30 : vector<1x8x128xf32>
    %cst_11 = arith.constant 0.000000e+00 : f32
    %32 = vector.broadcast %cst_11 : f32 to vector<1x8x128xf32>
    %33 = arith.maximumf %31, %32 : vector<1x8x128xf32>
    %34 = vector.shape_cast %33 : vector<1x8x128xf32> to vector<8x128xf32>
    %c0_12 = arith.constant 0 : index
    %c0_13 = arith.constant 0 : index
    %35 = vector.load %arg4[%c0_12, %c0_13] : memref<128x128xf32, #tpu.memory_space<vmem>>, vector<128x128xf32>
    %cst_14 = arith.constant dense<0.000000e+00> : vector<8x128xf32>
    %36 = tpu.matmul %34, %35, %cst_14 {dimension_numbers = #tpu.dot_dimension_numbers<[1], [0], [0], [1], [0, 0, 1, 1], [], []>} : vector<8x128xf32>, vector<128x128xf32>, vector<8x128xf32> -> vector<8x128xf32>
    %37 = vector.broadcast %3 : vector<1x128xf32> to vector<8x128xf32>
    %38 = arith.addf %36, %37 : vector<8x128xf32>
    %39 = vector.shape_cast %38 : vector<8x128xf32> to vector<1x8x128xf32>
    %c0_15 = arith.constant 0 : index
    %c0_16 = arith.constant 0 : index
    %c0_17 = arith.constant 0 : index
    %40 = vector.load %arg5[%c0_15, %c0_16, %c0_17] : memref<1x8x128xf32, #tpu.memory_space<vmem>>, vector<1x8x128xf32>
    tpu.vector_store %arg5[%c0_15, %c0_16, %c0_17], %39 {strides = array<i32>} : memref<1x8x128xf32, #tpu.memory_space<vmem>>, vector<1x8x128xf32>,
    return
  }
  func.func @transform_0(%arg0: i32) -> (i32, i32, i32) {
    %c0_i32 = arith.constant 0 : i32
    %c0_i32_0 = arith.constant 0 : i32
    %c0_i32_1 = arith.constant 0 : i32
    return %arg0, %c0_i32, %c0_i32_0 : i32, i32, i32
  }
  func.func @transform_1(%arg0: i32) -> (i32, i32) {
    %c0_i32 = arith.constant 0 : i32
    %c0_i32_0 = arith.constant 0 : i32
    %c0_i32_1 = arith.constant 0 : i32
    return %c0_i32, %c0_i32_0 : i32, i32
  }
  func.func @transform_2(%arg0: i32) -> (i32, i32) {
    %c0_i32 = arith.constant 0 : i32
    %c0_i32_0 = arith.constant 0 : i32
    %c0_i32_1 = arith.constant 0 : i32
    return %c0_i32, %c0_i32_0 : i32, i32
  }
  func.func @transform_3(%arg0: i32) -> (i32, i32) {
    %c0_i32 = arith.constant 0 : i32
    %c0_i32_0 = arith.constant 0 : i32
    %c0_i32_1 = arith.constant 0 : i32
    return %c0_i32, %c0_i32_0 : i32, i32
  }
  func.func @transform_4(%arg0: i32) -> (i32, i32, i32) {
    %c0_i32 = arith.constant 0 : i32
    %c0_i32_0 = arith.constant 0 : i32
    %c0_i32_1 = arith.constant 0 : i32
    return %arg0, %c0_i32, %c0_i32_0 : i32, i32, i32
  }
}

</mosaic_0001>

<bundles_post_ra>
// kernel: probvar_forward.1
= control target key start
LH: loop header
LB: loop body
LE: loop exit
PB: predicated region body
PF: predicated region fallthrough
CT: control target
= control target key end

     0   :  { %9 = vsyncpa [#allocation3], 0  ;;  %s288_s0 = inlined_call_operand.vmem [shape: f32[1,8,128], index: 0, kind: input, shape index: {}]   ;;  %s289_s1 = inlined_call_operand.hbm [shape: f32[128,128], index: 1, kind: input, shape index: {}]   ;;  %s290_s2 = inlined_call_operand.vmem [shape: f32[3,128], index: 2, kind: input, shape index: {}]   ;;  %s291_s3 = inlined_call_operand.hbm [shape: f32[128,128], index: 3, kind: input, shape index: {}]   ;;  %s292_s4 = inlined_call_operand.vmem [shape: f32[1,8,128], index: 4, kind: output, shape index: {}]  }
   0x1   :  { %s17_s17 = sshll.u32 %s289_s1, 4  ;;  %s18_s17 = int_to_ptr.hbm [resolvable:$true] %s17_s17 }
   0x2   :  { %10 = vsyncpa [#allocation5], 0  ;;  %s237_s18 = smov [#allocation2]   ;;  %s32_s22 = sshll.u32 %s291_s3, 4  ;;  %s33_s22 = int_to_ptr.hbm [resolvable:$true] %s32_s22 }
   0x3   :  { %s19_s19 = sshll.u32 %s237_s18, 4  ;;  %s238_s23 = smov 128   ;;  %s20_s19 = int_to_ptr.vmem [resolvable:$true] %s19_s19 }
   0x4   :  { %s239_s24 = smov 8   ;;  %s240_s25 = smov [#allocation4]  }
   0x5   :  { %25 = dma.hbm_to_vmem [thread:$0]  %s18_s17, 2048, %s20_s19, [#allocation3], %s238_s23, %s238_s23, %s239_s24  }
   0x6   :  { %s34_s26 = sshll.u32 %s240_s25, 4  ;;  %s35_s26 = int_to_ptr.vmem [resolvable:$true] %s34_s26 }
   0x7   :  { %40 = dma.hbm_to_vmem [thread:$0]  %s33_s22, 2048, %s35_s26, [#allocation5], %s238_s23, %s238_s23, %s239_s24  }
   0x8   :  { %233 = dma.done.wait [#allocation3], 2048  }
   0x9   :  { %234 = vsyncadd [#allocation3], 4294965248 }
   0xa   :  { %235 = dma.done.wait [#allocation5], 2048  }
   0xb   :  { %236 = vsyncadd [#allocation5], 4294965248  ;;  %v66_v0 = vld [vmem:[#allocation2 + $0x78] sm:$0xff]  ;;  %v65_v1 = vld [vmem:[#allocation2 + $0x70] sm:$0xff]  ;;  %v241_v17 = vmov 8.0  }
   0xc   :  { %67 = vmatpush.msra.mxu0 %v66_v0  ;;  %v64_v2 = vld [vmem:[#allocation2 + $0x68] sm:$0xff]  ;;  %v63_v3 = vld [vmem:[#allocation2 + $0x60] sm:$0xff]  ;;  %v62_v4 = vld [vmem:[#allocation2 + $0x58] sm:$0xff]  ;;  %181 = vrcp.f32 %v241_v17 }
   0xd   :  { %v61_v5 = vld [vmem:[#allocation2 + $0x50] sm:$0xff]  ;;  %v60_v6 = vld [vmem:[#allocation2 + $0x48] sm:$0xff]  ;;  %v59_v7 = vld [vmem:[#allocation2 + $0x40] sm:$0xff] }
   0xe   :  { %68 = vmatpush.msra.mxu0 %v65_v1  ;;  %v58_v8 = vld [vmem:[#allocation2 + $0x38] sm:$0xff]  ;;  %v57_v9 = vld [vmem:[#allocation2 + $0x30] sm:$0xff]  ;;  %v56_v10 = vld [vmem:[#allocation2 + $0x28] sm:$0xff] }
   0xf   :  { %v55_v11 = vld [vmem:[#allocation2 + $0x20] sm:$0xff]  ;;  %v54_v12 = vld [vmem:[#allocation2 + $0x18] sm:$0xff]  ;;  %v53_v13 = vld [vmem:[#allocation2 + $0x10] sm:$0xff] }
  0x10   :  { %69 = vmatpush.msra.mxu0 %v64_v2  ;;  %v52_v14 = vld [vmem:[#allocation2 + $0x8] sm:$0xff]  ;;  %v51_v15 = vld [vmem:[#allocation2] sm:$0xff]  ;;  %v147_v25 = vld [vmem:[#allocation4 + $0x78] sm:$0xff] }
  0x11   :  { %v50_v16 = vld [vmem:[%s288_s0] sm:$0xff]  ;;  %149 = vmatpush.msra.mxu1 %v147_v25  ;;  %v146_v27 = vld [vmem:[#allocation4 + $0x70] sm:$0xff]  ;;  %v145_v30 = vld [vmem:[#allocation4 + $0x68] sm:$0xff] }
  0x12   :  { %70 = vmatpush.msra.mxu0 %v63_v3  ;;  %v182_v18 = vpop.eup %181  ;;  %v144_v32 = vld [vmem:[#allocation4 + $0x60] sm:$0xff]  ;;  %v143_v35 = vld [vmem:[#allocation4 + $0x58] sm:$0xff]  ;;  %v142_v37 = vld [vmem:[#allocation4 + $0x50] sm:$0xff] }
  0x13   :  { %v94_v19 = vmul.f32 8.0, %v182_v18  ;;  %150 = vmatpush.msra.mxu1 %v146_v27  ;;  %vm98_vm0 = vweird.f32 %v182_v18  ;;  %v141_v39 = vld [vmem:[#allocation4 + $0x48] sm:$0xff]  ;;  %v140_v41 = vld [vmem:[#allocation4 + $0x40] sm:$0xff]  ;;  %v139_v43 = vld [vmem:[#allocation4 + $0x38] sm:$0xff] }
  0x14   :  { %71 = vmatpush.msra.mxu0 %v62_v4  ;;  %v138_v45 = vld [vmem:[#allocation4 + $0x30] sm:$0xff]  ;;  %v137_v47 = vld [vmem:[#allocation4 + $0x28] sm:$0xff]  ;;  %v136_v49 = vld [vmem:[#allocation4 + $0x20] sm:$0xff] }
  0x15   :  { %v95_v20 = vsub.f32 1.0, %v94_v19  ;;  %151 = vmatpush.msra.mxu1 %v145_v30  ;;  %v135_v50 = vld [vmem:[#allocation4 + $0x18] sm:$0xff]  ;;  %v134_v52 = vld [vmem:[#allocation4 + $0x10] sm:$0xff]  ;;  %v133_v54 = vld [vmem:[#allocation4 + $0x8] sm:$0xff] }
  0x16   :  { %72 = vmatpush.msra.mxu0 %v61_v5  ;;  %v132_v56 = vld [vmem:[#allocation4] sm:$0xff] }
  0x17   :  { %v96_v23 = vmul.f32 %v182_v18, %v95_v20  ;;  %152 = vmatpush.msra.mxu1 %v144_v32  ;;  %v49_v63 = vld [vmem:[%s290_s2] sm:$0x7] }
  0x18   :  { %73 = vmatpush.msra.mxu0 %v60_v6 }
  0x19   :  { %v97_v28 = vadd.f32 %v182_v18, %v96_v23  ;;  %153 = vmatpush.msra.mxu1 %v143_v35 }
  0x1a   :  { %74 = vmatpush.msra.mxu0 %v59_v7 }
  0x1b   :  { %v99_v33 = vsel %vm98_vm0, %v182_v18, %v97_v28  ;;  %154 = vmatpush.msra.mxu1 %v142_v37 }
  0x1c   :  { %75 = vmatpush.msra.mxu0 %v58_v8 }
  0x1d   :  { %155 = vmatpush.msra.mxu1 %v141_v39 }
  0x1e   :  { %76 = vmatpush.msra.mxu0 %v57_v9 }
  0x1f   :  { %156 = vmatpush.msra.mxu1 %v140_v41 }
  0x20   :  { %77 = vmatpush.msra.mxu0 %v56_v10 }
  0x21   :  { %157 = vmatpush.msra.mxu1 %v139_v43 }
  0x22   :  { %78 = vmatpush.msra.mxu0 %v55_v11  ;;  %v148_v11 = vperm.slane %v49_v63, 2 }
  0x23   :  { %158 = vmatpush.msra.mxu1 %v138_v45 }
  0x24   :  { %79 = vmatpush.msra.mxu0 %v54_v12 }
  0x25   :  { %159 = vmatpush.msra.mxu1 %v137_v47 }
  0x26   :  { %80 = vmatpush.msra.mxu0 %v53_v13 }
  0x27   :  { %160 = vmatpush.msra.mxu1 %v136_v49 }
  0x28   :  { %81 = vmatpush.msra.mxu0 %v52_v14 }
  0x29   :  { %161 = vmatpush.msra.mxu1 %v135_v50 }
  0x2a   :  { %82 = vmatpush.msra.mxu0 %v51_v15 }
  0x2b   :  { %83 = vmatmul.f32.vlgmr.msra.gmra.mxu0 %v50_v16  ;;  %162 = vmatpush.msra.mxu1 %v134_v52 }
  0x2d   :  { %163 = vmatpush.msra.mxu1 %v133_v54 }
  0x2f   :  { %164 = vmatpush.msra.mxu1 %v132_v56 }
  0xa8   :  { %v276_v21 = vpop.f32.mrf.mxu0 }
  0xa9   :  { %v87_v22 = vrot.slane %v276_v21, 4 }
  0xab   :  { %v88_v24 = vadd.f32 %v87_v22, %v276_v21 }
  0xad   :  { %v89_v26 = vrot.slane %v88_v24, 2 }
  0xaf   :  { %v90_v29 = vadd.f32 %v89_v26, %v88_v24 }
  0xb1   :  { %v91_v31 = vrot.slane %v90_v29, 1 }
  0xb3   :  { %v92_v34 = vadd.f32 %v91_v31, %v90_v29 }
  0xb5   :  { %v100_v36 = vmul.f32 %v99_v33, %v92_v34 }
  0xb7   :  { %v101_v38 = vsub.f32 %v276_v21, %v100_v36 }
  0xb9   :  { %v102_v40 = vmul.f32 %v101_v38, %v101_v38 }
  0xbb   :  { %v103_v42 = vrot.slane %v102_v40, 4 }
  0xbd   :  { %v104_v44 = vadd.f32 %v103_v42, %v102_v40 }
  0xbf   :  { %v105_v46 = vrot.slane %v104_v44, 2 }
  0xc1   :  { %v106_v48 = vadd.f32 %v105_v46, %v104_v44 }
  0xc3   :  { %v107_v51 = vrot.slane %v106_v48, 1 }
  0xc5   :  { %v108_v53 = vadd.f32 %v107_v51, %v106_v48 }
  0xc7   :  { %v109_v55 = vmul.f32 %v108_v53, %v99_v33 }
  0xc9   :  { %v110_v57 = vadd.f32 1e-05, %v109_v55 }
  0xcb   :  { %183 = vrsqrt.f32 %v110_v57  ;;  %vm117_vm2 = vweird.f32 %v110_v57 }
  0xd1   :  { %v184_v58 = vpop.eup %183 }
  0xd2   :  { %v112_v59 = vmul.f32 %v184_v58, %v110_v57  ;;  %vm118_vm1 = vweird.f32 %v184_v58 }
  0xd3   :  { %vm119_vm3 = vmor %vm117_vm2, %vm118_vm1 }
  0xd4   :  { %v113_v60 = vmul.f32 %v184_v58, %v112_v59 }
  0xd6   :  { %v114_v61 = vmul.f32 0.5, %v113_v60 }
  0xd8   :  { %v115_v62 = vsub.f32 1.5, %v114_v61 }
  0xda   :  { %v116_v0 = vmul.f32 %v184_v58, %v115_v62 }
  0xdc   :  { %v120_v1 = vsel %vm119_vm3, %v184_v58, %v116_v0 }
  0xdd   :  { %v121_v2 = vmul.f32 %v120_v1, %v49_v63 }
  0xdf   :  { %v122_v3 = vmul.f32 %v121_v2, %v100_v36  ;;  %v127_v4 = vperm.slane %v121_v2, 0 }
  0xe1   :  { %v124_v5 = vrot.slane %v122_v3, 7  ;;  %v128_v7 = vmul.f32 %v127_v4, %v276_v21 }
  0xe3   :  { %v126_v6 = vsub.f32 %v49_v63, %v124_v5 }
  0xe5   :  { %v129_v8 = vperm.slane %v126_v6, 1 }
  0xe7   :  { %v130_v9 = vadd.f32 %v129_v8, %v128_v7 }
  0xe9   :  { %v131_v10 = vmax.f32 %v130_v9, 0.0 }
  0xeb   :  { %165 = vmatmul.f32.vlgmr.msra.gmra.mxu1 %v131_v10 }
 0x168   :  { %v166_v12 = vpop.f32.mrf.mxu1 }
 0x169   :  { %v167_v13 = vadd.f32 %v166_v12, %v148_v11 }
 0x16b   :  { %169 = vst [vmem:[%s292_s4] sm:$0xff] %v167_v13 }
 0x16c   :  { %174 = vsyncpa [#allocation3], 1 }
 0x16d   :  { %175 = vsyncpa [#allocation5], 1 }

</bundles_post_ra>
